<compile_context>
chip_gen: v7x
topology: tpu7x:2x2x1
jax: 0.10.0
libtpu: 0.0.40
codegen_flags: <defaults>
</compile_context>

<pallas_src>
import functools

import jax
import jax.numpy as jnp
from jax.experimental import pallas as pl
from jax.experimental.pallas import tpu as pltpu


_LN_EPS = 1e-5


def _layernorm(v, w, b):
    # v: (rows, D) f32 ; w, b: (1, D) f32
    mu = jnp.mean(v, axis=-1, keepdims=True)
    var = jnp.mean((v - mu) ** 2, axis=-1, keepdims=True)
    return (v - mu) * jax.lax.rsqrt(var + _LN_EPS) * w + b


def _gelu_exact(x):
    # erf-based ("exact") GELU matching torch.nn.functional.gelu's default.
    # erf via the Abramowitz–Stegun 7.1.26 polynomial (|err| < 1.5e-7): only
    # VPU mul/add/where + one EUP exp, no reliance on a lax.erf lowering.
    z = x * 0.7071067811865476
    a = jnp.abs(z)
    t = 1.0 / (1.0 + 0.3275911 * a)
    poly = t * (0.254829592 + t * (-0.284496736 + t * (1.421413741
           + t * (-1.453152027 + t * 1.061405429))))
    erf_abs = 1.0 - poly * jnp.exp(-a * a)
    erf = jnp.where(z >= 0.0, erf_abs, -erf_abs)
    return 0.5 * x * (1.0 + erf)


# ----------------------------- pass 1: LN1 + fused QKV ----------------------------- #

def _qkv_kernel(x_ref, ln1w_ref, ln1b_ref, wqkv_ref, bqkv_ref,
                q_ref, k_ref, v_ref, *, n_heads, head_dim, rows):
    d_model = n_heads * head_dim
    x = x_ref[0].astype(jnp.float32)                                     # (rows, D)
    xn = _layernorm(x, ln1w_ref[...], ln1b_ref[...]).astype(jnp.bfloat16)
    qkv = jnp.dot(xn, wqkv_ref[...],
                  preferred_element_type=jnp.float32) + bqkv_ref[...]    # (rows, 3D)

    def to_heads(t):                                                     # (rows,D)->(H,rows,hd)
        return (t.astype(jnp.bfloat16)
                 .reshape(rows, n_heads, head_dim).transpose(1, 0, 2))

    q_ref[0] = to_heads(qkv[:, :d_model])            # 1/sqrt(hd) already folded into Wq/bq
    k_ref[0] = to_heads(qkv[:, d_model:2 * d_model])
    v_ref[0] = to_heads(qkv[:, 2 * d_model:])


# ------------------- pass 2: flash attention + out-proj + LN2 + FFN ------------------ #

def _attn_ffn_kernel(x_ref, q_ref, k_ref, v_ref,
                     wo_ref, bo_ref, ln2w_ref, ln2b_ref,
                     w1_ref, b1_ref, w2_ref, b2_ref,
                     o_ref, m_s, l_s, acc_s, *, n_heads, head_dim, tq):
    ki = pl.program_id(2)
    d_model = n_heads * head_dim

    @pl.when(ki == 0)
    def _():
        m_s[...] = jnp.full(m_s.shape, -jnp.inf, jnp.float32)
        l_s[...] = jnp.zeros(l_s.shape, jnp.float32)
        acc_s[...] = jnp.zeros(acc_s.shape, jnp.float32)

    q = q_ref[0]                                     # (H, TQ, hd) bf16 (scale folded)
    k = k_ref[0]                                     # (H, TK, hd) bf16
    v = v_ref[0]                                     # (H, TK, hd) bf16

    # online-softmax update over this KV tile (live tile bounded to (H, TQ, TK))
    s = jnp.einsum("hqd,hkd->hqk", q, k, preferred_element_type=jnp.float32)
    m_new = jnp.maximum(m_s[...], jnp.max(s, axis=-1, keepdims=True))
    alpha = jnp.exp(m_s[...] - m_new)
    p = jnp.exp(s - m_new)
    l_s[...] = alpha * l_s[...] + jnp.sum(p, axis=-1, keepdims=True)
    acc_s[...] = alpha * acc_s[...] + jnp.einsum(
        "hqk,hkd->hqd", p.astype(jnp.bfloat16), v, preferred_element_type=jnp.float32)
    m_s[...] = m_new

    @pl.when(ki == pl.num_programs(2) - 1)
    def _():
        ctx = acc_s[...] * pl.reciprocal(l_s[...], approx=True)          # (H, TQ, hd)
        attn = ctx.transpose(1, 0, 2).reshape(tq, d_model)               # head fold: once per q-tile
        attn = jnp.dot(attn.astype(jnp.bfloat16), wo_ref[...],
                       preferred_element_type=jnp.float32) + bo_ref[...]
        x1 = x_ref[0].astype(jnp.float32) + attn                         # residual 1 (dropout = id)
        x1n = _layernorm(x1, ln2w_ref[...], ln2b_ref[...])
        h = jnp.dot(x1n.astype(jnp.bfloat16), w1_ref[...],
                    preferred_element_type=jnp.float32) + b1_ref[...]
        h = _gelu_exact(h)
        ff = jnp.dot(h.astype(jnp.bfloat16), w2_ref[...],
                     preferred_element_type=jnp.float32) + b2_ref[...]
        o_ref[0] = (x1 + ff).astype(o_ref.dtype)                         # residual 2


# ------------------------------------ wrapper ------------------------------------ #

def _const_spec(shape):
    # Constant-index operand: index_map never changes, so a second pipeline buffer
    # is pure VMEM waste -> single-buffer it.
    return pl.BlockSpec(shape, lambda *_: (0,) * len(shape),
                        pipeline_mode=pl.Buffered(1))


def _vmem_limit_bytes():
    # Generation-aware limit (~85% of physical VMEM) instead of a hard 64 MiB cap.
    try:
        cap = pltpu.get_tpu_info().vmem_capacity_bytes
    except Exception:
        cap = 64 * 2 ** 20
    return int(cap * 0.85)


def prepare_params(params, *, n_heads):
    """One-time kernel-side weight prep: fuse QKV weights, fold 1/sqrt(head_dim)
    into Wq/bq, cast matmul weights to bf16.  Cache the result across calls."""
    D = params["wq"].shape[0]
    head_dim = D // n_heads
    scale = head_dim ** (-0.5)
    cdt = jnp.bfloat16
    wqkv = jnp.concatenate(
        [params["wq"] * scale, params["wk"], params["wv"]], axis=1).astype(cdt)
    bqkv = jnp.concatenate(
        [params["bq"] * scale, params["bk"], params["bv"]], axis=1).astype(jnp.float32)
    return dict(
        ln1_w=params["ln1_w"], ln1_b=params["ln1_b"],
        wqkv=wqkv, bqkv=bqkv,
        wo=params["wo"].astype(cdt), bo=params["bo"],
        ln2_w=params["ln2_w"], ln2_b=params["ln2_b"],
        w1=params["w1"].astype(cdt), b1=params["b1"],
        w2=params["w2"].astype(cdt), b2=params["b2"],
    )


def encoder_layer(x, prep, *, n_heads, q_tile=256, kv_tile=256, pre_tile=256):
    B, L, D = x.shape
    assert D % n_heads == 0
    head_dim = D // n_heads
    d_ff = prep["w1"].shape[1]

    tq = min(L, q_tile)      # 256 matches the v6e/v7x 256-wide MXU; clamp for short seqs
    tk = min(L, kv_tile)
    tp = min(L, pre_tile)
    assert L % tq == 0 and L % tk == 0 and L % tp == 0, \
        "seq_len must be a multiple of the q / kv / precompute tiles"

    vmem_limit = _vmem_limit_bytes()

    # ---- pass 1: LN1 + fused QKV projection -> head-major Q/K/V (bf16) in HBM ----
    qkv_shape = jax.ShapeDtypeStruct((B, n_heads, L, head_dim), jnp.bfloat16)
    qkv_kernel = functools.partial(
        _qkv_kernel, n_heads=n_heads, head_dim=head_dim, rows=tp)
    q_hbm, k_hbm, v_hbm = pl.pallas_call(
        qkv_kernel,
        out_shape=(qkv_shape, qkv_shape, qkv_shape),
        grid_spec=pltpu.PrefetchScalarGridSpec(
            num_scalar_prefetch=0,
            grid=(B, L // tp),
            in_specs=[
                pl.BlockSpec((1, tp, D), lambda b, r: (b, r, 0)),       # x row tile
                _const_spec((1, D)), _const_spec((1, D)),               # ln1 w/b
                _const_spec((D, 3 * D)), _const_spec((1, 3 * D)),       # fused Wqkv / bqkv
            ],
            out_specs=tuple(
                pl.BlockSpec((1, n_heads, tp, head_dim), lambda b, r: (b, 0, r, 0))
                for _ in range(3)),
        ),
        compiler_params=pltpu.CompilerParams(
            dimension_semantics=("parallel", "parallel"),
            vmem_limit_bytes=vmem_limit,
        ),
    )(x, prep["ln1_w"], prep["ln1_b"], prep["wqkv"], prep["bqkv"])

    # ---- pass 2: flash attention + out-proj + residual + LN2 + FFN + residual ----
    attn_kernel = functools.partial(
        _attn_ffn_kernel, n_heads=n_heads, head_dim=head_dim, tq=tq)
    return pl.pallas_call(
        attn_kernel,
        out_shape=jax.ShapeDtypeStruct((B, L, D), x.dtype),
        grid_spec=pltpu.PrefetchScalarGridSpec(
            num_scalar_prefetch=0,
            grid=(B, L // tq, L // tk),                                  # reduction (kv) axis last
            in_specs=[
                pl.BlockSpec((1, tq, D), lambda b, q, k: (b, q, 0)),     # x (residual), per q-tile
                pl.BlockSpec((1, n_heads, tq, head_dim), lambda b, q, k: (b, 0, q, 0)),
                pl.BlockSpec((1, n_heads, tk, head_dim), lambda b, q, k: (b, 0, k, 0)),
                pl.BlockSpec((1, n_heads, tk, head_dim), lambda b, q, k: (b, 0, k, 0)),
                _const_spec((D, D)), _const_spec((1, D)),                # Wo / bo
                _const_spec((1, D)), _const_spec((1, D)),                # ln2 w/b
                _const_spec((D, d_ff)), _const_spec((1, d_ff)),          # fc1
                _const_spec((d_ff, D)), _const_spec((1, D)),             # fc2
            ],
            out_specs=pl.BlockSpec((1, tq, D), lambda b, q, k: (b, q, 0)),
            scratch_shapes=[
                pltpu.VMEM((n_heads, tq, 1), jnp.float32),               # running max
                pltpu.VMEM((n_heads, tq, 1), jnp.float32),               # running denominator
                pltpu.VMEM((n_heads, tq, head_dim), jnp.float32),        # running numerator
            ],
        ),
        compiler_params=pltpu.CompilerParams(
            dimension_semantics=("parallel", "parallel", "arbitrary"),
            vmem_limit_bytes=vmem_limit,
        ),
    )(x, q_hbm, k_hbm, v_hbm,
      prep["wo"], prep["bo"], prep["ln2_w"], prep["ln2_b"],
      prep["w1"], prep["b1"], prep["w2"], prep["b2"])


# ----------------------------- params / pure-JAX reference ----------------------------- #

def init_params(key, d_model, d_ff):
    """Deterministic synthetic params (f32, canonical). Linear weights stored [in, out]."""
    ks = jax.random.split(key, 6)

    def lin(k, fan_in, fan_out):
        bound = 1.0 / (fan_in ** 0.5)   # matches nn.Linear default init scale
        kw, kb = jax.random.split(k)
        w = jax.random.uniform(kw, (fan_in, fan_out), jnp.float32, -bound, bound)
        b = jax.random.uniform(kb, (1, fan_out), jnp.float32, -bound, bound)
        return w, b

    wq, bq = lin(ks[0], d_model, d_model)
    wk, bk = lin(ks[1], d_model, d_model)
    wv, bv = lin(ks[2], d_model, d_model)
    wo, bo = lin(ks[3], d_model, d_model)
    w1, b1 = lin(ks[4], d_model, d_ff)
    w2, b2 = lin(ks[5], d_ff, d_model)

    return dict(
        ln1_w=jnp.ones((1, d_model), jnp.float32),
        ln1_b=jnp.zeros((1, d_model), jnp.float32),
        ln2_w=jnp.ones((1, d_model), jnp.float32),
        ln2_b=jnp.zeros((1, d_model), jnp.float32),
        wq=wq, bq=bq, wk=wk, bk=bk, wv=wv, bv=bv, wo=wo, bo=bo,
        w1=w1, b1=b1, w2=w2, b2=b2,
    )


def encoder_layer_ref(x, p, *, n_heads):
    """Pure-JAX f32 reference mirroring the PyTorch forward (dropout = identity)."""
    B, L, D = x.shape
    hd = D // n_heads

    def ln(v, w, b):
        mu = jnp.mean(v, -1, keepdims=True)
        var = jnp.mean((v - mu) ** 2, -1, keepdims=True)
        return (v - mu) * jax.lax.rsqrt(var + _LN_EPS) * w[0] + b[0]

    xn = ln(x, p["ln1_w"], p["ln1_b"])
    q = xn @ p["wq"] + p["bq"][0]
    k = xn @ p["wk"] + p["bk"][0]
    v = xn @ p["wv"] + p["bv"][0]
    q = q.reshape(B, L, n_heads, hd).transpose(0, 2, 1, 3)
    k = k.reshape(B, L, n_heads, hd).transpose(0, 2, 1, 3)
    v = v.reshape(B, L, n_heads, hd).transpose(0, 2, 1, 3)
    s = jnp.einsum("bhld,bhsd->bhls", q, k) * (hd ** -0.5)
    a = jax.nn.softmax(s, axis=-1)
    o = jnp.einsum("bhls,bhsd->bhld", a, v).transpose(0, 2, 1, 3).reshape(B, L, D)
    o = o @ p["wo"] + p["bo"][0]
    x1 = x + o
    x1n = ln(x1, p["ln2_w"], p["ln2_b"])
    h = jax.nn.gelu(x1n @ p["w1"] + p["b1"][0], approximate=False)
    ff = h @ p["w2"] + p["b2"][0]
    return x1 + ff


if __name__ == "__main__":
    # TODO(synk): dropout treated as identity (eval mode); the attn_weights second
    # return value (output_attention=True path) and the attn_mask path are not
    # emitted by the kernel (attn_mask=None only).
    B, L, D, d_ff, n_heads = 2, 8, 32, 64, 4

    key = jax.random.PRNGKey(0)
    kx, kp = jax.random.split(key)
    x = jax.random.normal(kx, (B, L, D), jnp.float32)
    params = init_params(kp, D, d_ff)
    prep = prepare_params(params, n_heads=n_heads)   # one-time weight prep (cache & reuse)

    out = jax.block_until_ready(encoder_layer(x, prep, n_heads=n_heads))
    ref = encoder_layer_ref(x, params, n_heads=n_heads)

    assert out.shape == (B, L, D)
    # bf16 MXU operands + approx softmax reciprocal vs an all-f32 reference
    assert jnp.allclose(out, ref, rtol=3e-2, atol=3e-2), "mismatch vs JAX reference"

    print("KERNEL_OK")
</pallas_src>

<mosaic_0001>
module attributes {stable_mosaic.version = 11 : i64} {
  func.func @_qkv_kernel(%arg0: i32, %arg1: i32, %arg2: memref<1x8x32xf32, #tpu.memory_space<vmem>>, %arg3: memref<1x32xf32, #tpu.memory_space<vmem>>, %arg4: memref<1x32xf32, #tpu.memory_space<vmem>>, %arg5: memref<32x96xbf16, #tpu.memory_space<vmem>>, %arg6: memref<1x96xf32, #tpu.memory_space<vmem>>, %arg7: memref<1x4x8x8xbf16, #tpu.memory_space<vmem>>, %arg8: memref<1x4x8x8xbf16, #tpu.memory_space<vmem>>, %arg9: memref<1x4x8x8xbf16, #tpu.memory_space<vmem>>) attributes {dimension_semantics = [#tpu.dimension_semantics<parallel>, #tpu.dimension_semantics<parallel>], iteration_bounds = array<i64: 2, 1>, scalar_prefetch = 0 : i64, scratch_operands = 0 : i64, tpu.core_type = #tpu.core_type<tc>, window_params = [{transform_indices = @transform_0, window_bounds = array<i64: 1, 8, 32>}, {pipeline_mode = #tpu.pipeline_mode<synchronous>, transform_indices = @transform_1, window_bounds = array<i64: 1, 32>}, {pipeline_mode = #tpu.pipeline_mode<synchronous>, transform_indices = @transform_2, window_bounds = array<i64: 1, 32>}, {pipeline_mode = #tpu.pipeline_mode<synchronous>, transform_indices = @transform_3, window_bounds = array<i64: 32, 96>}, {pipeline_mode = #tpu.pipeline_mode<synchronous>, transform_indices = @transform_4, window_bounds = array<i64: 1, 96>}, {transform_indices = @transform_5, window_bounds = array<i64: 1, 4, 8, 8>}, {transform_indices = @transform_6, window_bounds = array<i64: 1, 4, 8, 8>}, {transform_indices = @transform_7, window_bounds = array<i64: 1, 4, 8, 8>}]} {
    %c0 = arith.constant 0 : index
    %c0_0 = arith.constant 0 : index
    %c0_1 = arith.constant 0 : index
    %0 = vector.load %arg2[%c0, %c0_0, %c0_1] : memref<1x8x32xf32, #tpu.memory_space<vmem>>, vector<1x8x32xf32>
    %1 = vector.shape_cast %0 : vector<1x8x32xf32> to vector<8x32xf32>
    %c0_2 = arith.constant 0 : index
    %c0_3 = arith.constant 0 : index
    %2 = vector.load %arg3[%c0_2, %c0_3] : memref<1x32xf32, #tpu.memory_space<vmem>>, vector<1x32xf32>
    %c0_4 = arith.constant 0 : index
    %c0_5 = arith.constant 0 : index
    %3 = vector.load %arg4[%c0_4, %c0_5] : memref<1x32xf32, #tpu.memory_space<vmem>>, vector<1x32xf32>
    %cst = arith.constant dense<0.000000e+00> : vector<8xf32>
    %4 = vector.multi_reduction <add>, %1, %cst [1] : vector<8x32xf32> to vector<8xf32>
    %5 = vector.shape_cast %4 : vector<8xf32> to vector<8x1xf32>
    %cst_6 = arith.constant 3.200000e+01 : f32
    %6 = vector.broadcast %cst_6 : f32 to vector<8x1xf32>
    %7 = arith.divf %5, %6 : vector<8x1xf32>
    %8 = vector.broadcast %7 : vector<8x1xf32> to vector<8x32xf32>
    %9 = arith.subf %1, %8 : vector<8x32xf32>
    %10 = arith.mulf %9, %9 : vector<8x32xf32>
    %cst_7 = arith.constant dense<0.000000e+00> : vector<8xf32>
    %11 = vector.multi_reduction <add>, %10, %cst_7 [1] : vector<8x32xf32> to vector<8xf32>
    %12 = vector.shape_cast %11 : vector<8xf32> to vector<8x1xf32>
    %cst_8 = arith.constant 3.200000e+01 : f32
    %13 = vector.broadcast %cst_8 : f32 to vector<8x1xf32>
    %14 = arith.divf %12, %13 : vector<8x1xf32>
    %15 = vector.broadcast %7 : vector<8x1xf32> to vector<8x32xf32>
    %16 = arith.subf %1, %15 : vector<8x32xf32>
    %cst_9 = arith.constant 9.99999974E-6 : f32
    %17 = vector.broadcast %cst_9 : f32 to vector<8x1xf32>
    %18 = arith.addf %14, %17 : vector<8x1xf32>
    %19 = math.rsqrt %18 : vector<8x1xf32>
    %20 = vector.broadcast %19 : vector<8x1xf32> to vector<8x32xf32>
    %21 = arith.mulf %16, %20 : vector<8x32xf32>
    %22 = vector.broadcast %2 : vector<1x32xf32> to vector<8x32xf32>
    %23 = arith.mulf %21, %22 : vector<8x32xf32>
    %24 = vector.broadcast %3 : vector<1x32xf32> to vector<8x32xf32>
    %25 = arith.addf %23, %24 : vector<8x32xf32>
    %26 = arith.truncf %25 : vector<8x32xf32> to vector<8x32xbf16>
    %c0_10 = arith.constant 0 : index
    %c0_11 = arith.constant 0 : index
    %27 = vector.load %arg5[%c0_10, %c0_11] : memref<32x96xbf16, #tpu.memory_space<vmem>>, vector<32x96xbf16>
    %cst_12 = arith.constant dense<0.000000e+00> : vector<8x96xf32>
    %28 = tpu.matmul %26, %27, %cst_12 {dimension_numbers = #tpu.dot_dimension_numbers<[1], [0], [0], [1], [0, 0, 1, 1], [], []>} : vector<8x32xbf16>, vector<32x96xbf16>, vector<8x96xf32> -> vector<8x96xf32>
    %c0_13 = arith.constant 0 : index
    %c0_14 = arith.constant 0 : index
    %29 = vector.load %arg6[%c0_13, %c0_14] : memref<1x96xf32, #tpu.memory_space<vmem>>, vector<1x96xf32>
    %30 = vector.broadcast %29 : vector<1x96xf32> to vector<8x96xf32>
    %31 = arith.addf %28, %30 : vector<8x96xf32>
    %32 = vector.extract_strided_slice %31 {offsets = [0, 0], sizes = [8, 32], strides = [1, 1]} : vector<8x96xf32> to vector<8x32xf32>
    %33 = arith.truncf %32 : vector<8x32xf32> to vector<8x32xbf16>
    %34 = vector.shape_cast %33 : vector<8x32xbf16> to vector<8x4x8xbf16>
    %35 = tpu.transpose %34, [1, 0, 2] : vector<8x4x8xbf16> -> vector<4x8x8xbf16>
    %c0_15 = arith.constant 0 : index
    %c0_16 = arith.constant 0 : index
    %c0_17 = arith.constant 0 : index
    %c0_18 = arith.constant 0 : index
    %36 = vector.load %arg7[%c0_15, %c0_16, %c0_17, %c0_18] : memref<1x4x8x8xbf16, #tpu.memory_space<vmem>>, vector<1x4x8x8xbf16>
    %37 = vector.shape_cast %36 : vector<1x4x8x8xbf16> to vector<4x8x8xbf16>
    %38 = vector.shape_cast %35 : vector<4x8x8xbf16> to vector<1x4x8x8xbf16>
    tpu.vector_store %arg7[%c0_15, %c0_16, %c0_17, %c0_18], %38 {strides = array<i32>} : memref<1x4x8x8xbf16, #tpu.memory_space<vmem>>, vector<1x4x8x8xbf16>,
    %39 = vector.extract_strided_slice %31 {offsets = [0, 32], sizes = [8, 32], strides = [1, 1]} : vector<8x96xf32> to vector<8x32xf32>
    %40 = arith.truncf %39 : vector<8x32xf32> to vector<8x32xbf16>
    %41 = vector.shape_cast %40 : vector<8x32xbf16> to vector<8x4x8xbf16>
    %42 = tpu.transpose %41, [1, 0, 2] : vector<8x4x8xbf16> -> vector<4x8x8xbf16>
    %c0_19 = arith.constant 0 : index
    %c0_20 = arith.constant 0 : index
    %c0_21 = arith.constant 0 : index
    %c0_22 = arith.constant 0 : index
    %43 = vector.load %arg8[%c0_19, %c0_20, %c0_21, %c0_22] : memref<1x4x8x8xbf16, #tpu.memory_space<vmem>>, vector<1x4x8x8xbf16>
    %44 = vector.shape_cast %43 : vector<1x4x8x8xbf16> to vector<4x8x8xbf16>
    %45 = vector.shape_cast %42 : vector<4x8x8xbf16> to vector<1x4x8x8xbf16>
    tpu.vector_store %arg8[%c0_19, %c0_20, %c0_21, %c0_22], %45 {strides = array<i32>} : memref<1x4x8x8xbf16, #tpu.memory_space<vmem>>, vector<1x4x8x8xbf16>,
    %46 = vector.extract_strided_slice %31 {offsets = [0, 64], sizes = [8, 32], strides = [1, 1]} : vector<8x96xf32> to vector<8x32xf32>
    %47 = arith.truncf %46 : vector<8x32xf32> to vector<8x32xbf16>
    %48 = vector.shape_cast %47 : vector<8x32xbf16> to vector<8x4x8xbf16>
    %49 = tpu.transpose %48, [1, 0, 2] : vector<8x4x8xbf16> -> vector<4x8x8xbf16>
    %c0_23 = arith.constant 0 : index
    %c0_24 = arith.constant 0 : index
    %c0_25 = arith.constant 0 : index
    %c0_26 = arith.constant 0 : index
    %50 = vector.load %arg9[%c0_23, %c0_24, %c0_25, %c0_26] : memref<1x4x8x8xbf16, #tpu.memory_space<vmem>>, vector<1x4x8x8xbf16>
    %51 = vector.shape_cast %50 : vector<1x4x8x8xbf16> to vector<4x8x8xbf16>
    %52 = vector.shape_cast %49 : vector<4x8x8xbf16> to vector<1x4x8x8xbf16>
    tpu.vector_store %arg9[%c0_23, %c0_24, %c0_25, %c0_26], %52 {strides = array<i32>} : memref<1x4x8x8xbf16, #tpu.memory_space<vmem>>, vector<1x4x8x8xbf16>,
    return
  }
  func.func @transform_0(%arg0: i32, %arg1: i32) -> (i32, i32, i32) {
    %c0_i32 = arith.constant 0 : i32
    %c0_i32_0 = arith.constant 0 : i32
    return %arg0, %arg1, %c0_i32 : i32, i32, i32
  }
  func.func @transform_1(%arg0: i32, %arg1: i32) -> (i32, i32) {
    %c0_i32 = arith.constant 0 : i32
    %c0_i32_0 = arith.constant 0 : i32
    %c0_i32_1 = arith.constant 0 : i32
    return %c0_i32, %c0_i32_0 : i32, i32
  }
  func.func @transform_2(%arg0: i32, %arg1: i32) -> (i32, i32) {
    %c0_i32 = arith.constant 0 : i32
    %c0_i32_0 = arith.constant 0 : i32
    %c0_i32_1 = arith.constant 0 : i32
    return %c0_i32, %c0_i32_0 : i32, i32
  }
  func.func @transform_3(%arg0: i32, %arg1: i32) -> (i32, i32) {
    %c0_i32 = arith.constant 0 : i32
    %c0_i32_0 = arith.constant 0 : i32
    %c0_i32_1 = arith.constant 0 : i32
    return %c0_i32, %c0_i32_0 : i32, i32
  }
  func.func @transform_4(%arg0: i32, %arg1: i32) -> (i32, i32) {
    %c0_i32 = arith.constant 0 : i32
    %c0_i32_0 = arith.constant 0 : i32
    %c0_i32_1 = arith.constant 0 : i32
    return %c0_i32, %c0_i32_0 : i32, i32
  }
  func.func @transform_5(%arg0: i32, %arg1: i32) -> (i32, i32, i32, i32) {
    %c0_i32 = arith.constant 0 : i32
    %c0_i32_0 = arith.constant 0 : i32
    %c0_i32_1 = arith.constant 0 : i32
    return %arg0, %c0_i32, %arg1, %c0_i32_0 : i32, i32, i32, i32
  }
  func.func @transform_6(%arg0: i32, %arg1: i32) -> (i32, i32, i32, i32) {
    %c0_i32 = arith.constant 0 : i32
    %c0_i32_0 = arith.constant 0 : i32
    %c0_i32_1 = arith.constant 0 : i32
    return %arg0, %c0_i32, %arg1, %c0_i32_0 : i32, i32, i32, i32
  }
  func.func @transform_7(%arg0: i32, %arg1: i32) -> (i32, i32, i32, i32) {
    %c0_i32 = arith.constant 0 : i32
    %c0_i32_0 = arith.constant 0 : i32
    %c0_i32_1 = arith.constant 0 : i32
    return %arg0, %c0_i32, %arg1, %c0_i32_0 : i32, i32, i32, i32
  }
}

</mosaic_0001>

<bundles_post_ra>
// kernel: tpu_custom_call.1
= control target key start
LH: loop header
LB: loop body
LE: loop exit
PB: predicated region body
PF: predicated region fallthrough
CT: control target
= control target key end

     0   :  { %s2011_s0 = inlined_call_operand.hbm [shape: f32[2,8,32], index: 0, kind: input, shape index: {}]   ;;  %s2012_s1 = inlined_call_operand.vmem [shape: f32[1,32], index: 1, kind: input, shape index: {}]   ;;  %s2013_s2 = inlined_call_operand.vmem [shape: f32[1,32], index: 2, kind: input, shape index: {}]   ;;  %s2014_s3 = inlined_call_operand.hbm [shape: bf16[32,96], index: 3, kind: input, shape index: {}]   ;;  %s2015_s4 = inlined_call_operand.vmem [shape: f32[1,96], index: 4, kind: input, shape index: {}]   ;;  %s2016_s5 = inlined_call_operand.hbm [shape: bf16[2,4,8,8], index: 5, kind: output, shape index: {0}]   ;;  %s2017_s6 = inlined_call_operand.hbm [shape: bf16[2,4,8,8], index: 6, kind: output, shape index: {1}]   ;;  %s2018_s7 = inlined_call_operand.hbm [shape: bf16[2,4,8,8], index: 7, kind: output, shape index: {2}]  }
   0x1   :  { %2024 = sst [smem:[#allocation16_spill]] %s2014_s3 }
   0x2   :  { %13 = vsyncpa [#allocation3], 0 }
   0x3   :  { %15 = vsyncpa [#allocation3 + $0x1], 0 }
   0x4   :  { %16 = vsyncpa [#allocation6], 0 }
   0x5   :  { %17 = vsyncpa [#allocation4], 0 }
   0x6   :  { %19 = vsyncpa [#allocation4 + $0x1], 0 }
   0x7   :  { %20 = vsyncpa [#allocation9], 0 }
   0x8   :  { %22 = vsyncpa [#allocation9 + $0x1], 0  ;;  %s1608_s24 = smov 0   ;;  %s1610_s25 = smov 0  }
   0x9   :  { %s1612_s26 = smov 0   ;;  %s1614_s27 = smov 0  }
   0xa   :  { %s1616_s28 = smov 0   ;;  %s1618_s29 = smov 0  }
   0xb LB: > { %s1639_s30 = sadd.s32 4294967295, %s1548_s29   ;;  %s2022_s8 = sadd.s32 4294967294, %s1548_s29   ;;  %s1548_s29 = sphi %s1618_s29, %s28_s29   ;;  %s1544_s28 = sphi %s1616_s28, %s2047_s28   ;;  %s1540_s27 = sphi %s1614_s27, %s2046_s27   ;;  %s1536_s26 = sphi %s1612_s26, %s2045_s26   ;;  %s1532_s25 = sphi %s1610_s25, %s2044_s25   ;;  %s1528_s24 = sphi %s1608_s24, %s2043_s24  }
   0xc   : > { %p62_p0 = scmp.ne.s32.totalorder %s1532_s25, %s1528_s24  ;;  %p2019_p1 = scmp.eq.s32.totalorder %s1639_s30, 0 }
   0xd   : > { %p178_p3 = scmp.eq.s32.totalorder %s2022_s8, 1  ;;  %p1202_p5 = scmp.ge.s32.totalorder %s1548_s29, 1 }
   0xe   : > { %p1650_p4 = por %p2019_p1, %p62_p0  ;;  %p241_p7 = scmp.lt.s32.totalorder %s1548_s29, 3 }
   0xf   : > { %p1655_p6 = por %p178_p3, %p62_p0  ;;  %s1550_s12 = smov [#allocation5]  }
  0x10   : > { %s2025_s9 = scalar_select %p1650_p4, 1, 0 }
  0x11   : > { %s2026_s10 = scalar_select %p1655_p6, 1, 0 }
  0x12   : > { %p1660_p8 = pnand %p1202_p5, %p241_p7  ;;  %s259_s13 = sshll.u32 %s1550_s12, 4  ;;  %s260_s13 = int_to_ptr.vmem [resolvable:$true] %s259_s13 }
  0x13   : > { %s40_s15 = sadd.s32 1, %s1544_s28  ;;  %s2029_s3 = sld [smem:[#allocation16_spill]] }
  0x14   : > { %s2027_s11 = scalar_select %p1660_p8, 1, 0 }
  0x15   : > { %p1256_p9 = pneg %p1660_p8 }
  0x17   : > { %p1669_p11 = pnand %p1256_p9, %p2019_p1 }
  0x19   : > { %s1344_s18 = scalar_lea.hbm %s2029_s3, 256  ;;  %p1346_p13 = pneg %p1669_p11 }
  0x1a   : > { %p1345_p12 = scmp.ne.s32.totalorder %s2029_s3, %s1344_s18  ;;  %p1351_p5 = scmp.lt.u32.totalorder %s1344_s18, %s2029_s3 }
  0x1c   : > { %p1347_p0 = pnand %p1346_p13, %p1345_p12 }
  0x1e   : > { %p1348_p3 = pneg %p1347_p0 }
  0x20   : > { %p1353_p7 = pnand %p1351_p5, %p1348_p3 }
  0x22   : > { %1356 = shalt.err (!%p1353_p7)
}
  0x23   : > { %s1357_s23 = scalar_lea.vmem %s260_s13, 256  ;;  %p1365_p2 = scmp.lt.s32.totalorder %s260_s13, %s260_s13 }
  0x24   : > { %p1358_p9 = scmp.ne.s32.totalorder %s260_s13, %s1357_s23  ;;  %p1366_p6 = scmp.lt.s32.totalorder %s1357_s23, %s1357_s23 }
  0x26   : > { %p1360_p10 = pnand %p1358_p9, %p1346_p13  ;;  %p1367_p4 = por %p1366_p6, %p1365_p2 }
  0x28   : > { %p1361_p1 = pneg %p1360_p10 }
  0x2a   : > { %p1368_p8 = pnand %p1367_p4, %p1361_p1 }
  0x2c   : > { %1371 = shalt.err (!%p1368_p8)
}
  0x2d   : > { %s1551_s12 = smov 64   ;;  %s1552_s16 = smov 4  }
  0x2e   : > { %1259 = dma.hbm_to_vmem [thread:$0]  (!%p1669_p11), %s2029_s3, 256, %s260_s13, [#allocation6], %s1551_s12, %s1551_s12, %s1552_s16  }
  0x2f   : > { %p42_p1 = scmp.ge.s32.totalorder %s40_s15, 2  ;;  %s49_s19 = sadd.s32 1, %s1536_s26 }
  0x30   : > { %p56_p2 = scmp.ne.s32.totalorder %s1536_s26, %s1532_s25  ;;  %p57_p4 = scmp.eq.s32.totalorder %s1548_s29, 0 }
  0x31   : > { %s2049_s15 = smov (%p42_p1, %s40_s15), 0  ;;  %p2032_p8 = scmp.eq.s32.totalorder %s1639_s30, 1 }
  0x32   : > { %2030 = sst [smem:[#allocation15_spill]] %s2049_s15  ;;  %p1696_p6 = por %p57_p4, %p56_p2 }
  0x33   : > { %p1702_p10 = por %p2032_p8, %p56_p2  ;;  %s44_s14 = ssub.s32 %s1544_s28, %s2049_s15 }
  0x34   : > { %p1275_p12 = scmp.lt.s32.totalorder %s1548_s29, 2  ;;  %p47_p11 = scmp.eq.s32.totalorder %s44_s14, 0 }
  0x35   : > { %s276_s13 = sand.u32 1, %s1536_s26   ;;  %s1206_s12 = sshll.u32 %s1544_s28, 7 }
  0x36   : > { %s1205_s22 = sshll.u32 %s276_s13, 3  ;;  %s1717_s18 = scalar_lea.hbm %s2011_s0, %s1206_s12 }
  0x37   : > { %s1711_s23 = scalar_select %p47_p11, %s1536_s26, %s49_s19  }
  0x38   : > { %s280_s8 = scalar_lea.vmem [#allocation2], %s1205_s22  ;;  %p1723_p13 = pnand %p1275_p12, %p1696_p6 }
  0x39   : > { %s288_s3 = sshll.u32 %s280_s8, 4  ;;  %s277_s19 = scalar_lea.sflag [#allocation3], %s276_s13  ;;  %s1719_s3 = int_to_ptr.vmem [resolvable:$true] %s288_s3 }
  0x3a   : > { %s1372_s15 = scalar_lea.hbm %s1717_s18, 128  ;;  %p1374_p3 = pneg %p1723_p13 }
  0x3b   : > { %p1373_p0 = scmp.ne.s32.totalorder %s1717_s18, %s1372_s15  ;;  %s1377_s12 = scalar_lea.hbm %s2011_s0, 256 }
  0x3c   : > { %p1378_p9 = scmp.lt.u32.totalorder %s1717_s18, %s2011_s0  ;;  %p1379_p1 = scmp.lt.u32.totalorder %s1377_s12, %s1372_s15 }
  0x3d   : > { %p1375_p5 = pnand %p1374_p3, %p1373_p0  ;;  %p1381_p4 = scmp.lt.u32.totalorder %s1372_s15, %s1717_s18 }
  0x3e   : > { %p1380_p2 = por %p1379_p1, %p1378_p9 }
  0x3f   : > { %p1376_p7 = pneg %p1375_p5 }
  0x40   : > { %p1382_p6 = por %p1381_p4, %p1380_p2 }
  0x42   : > { %p1383_p8 = pnand %p1382_p6, %p1376_p7 }
  0x44   : > { %1386 = shalt.err (!%p1383_p8)
}
  0x45   : > { %s1387_s13 = scalar_lea.vmem %s1719_s3, 128  ;;  %s1553_s17 = smov [#allocation2]  }
  0x46   : > { %p1388_p12 = scmp.ne.s32.totalorder %s1719_s3, %s1387_s13  ;;  %s1392_s22 = sshll.u32 %s1553_s17, 4  ;;  %s1393_s22 = int_to_ptr.vmem [resolvable:$false] %s1392_s22 }
  0x47   : > { %s1394_s8 = scalar_lea.vmem %s1393_s22, 256  ;;  %p1395_p5 = scmp.lt.s32.totalorder %s1719_s3, %s1393_s22 }
  0x48   : > { %p1390_p11 = pnand %p1388_p12, %p1374_p3  ;;  %p1396_p9 = scmp.lt.s32.totalorder %s1394_s8, %s1387_s13 }
  0x4a   : > { %p1391_p0 = pneg %p1390_p11  ;;  %p1397_p1 = por %p1396_p9, %p1395_p5 }
  0x4c   : > { %p1398_p2 = pnand %p1397_p1, %p1391_p0 }
  0x4e   : > { %1401 = shalt.err (!%p1398_p2)
}
  0x4f   : > { %1263 = dma.hbm_to_vmem [thread:$0]  (!%p1723_p13), %s1717_s18, 128, %s1719_s3, %s277_s19  }
  0x50   : > { %p2035_p7 = scmp.ne.s32.totalorder %s2027_s11, 0 }
  0x51   : > { %s1755_s15 = sand.u32 (!%p2035_p7), 1, %s1532_s25   ;;  %p2036_p3 = scmp.ne.s32.totalorder (!%p2035_p7), %s2025_s9, 0 }
  0x52   : > { %297 = sbr.rel (%p2035_p7) target bundleno = 930 (0x3a2), region = 40  ;;  %s1208_s12 = sshll.u32 (!%p2035_p7), %s1755_s15, 3 }
  0x53   : > { %s300_s20 = scalar_lea.sflag (!%p2035_p7), [#allocation3], %s1755_s15  ;;  %s303_s16 = scalar_lea.vmem (!%p2035_p7), [#allocation2], %s1208_s12 }
  0x59   : > { %1511 = dma.done.wait (%p2036_p3), %s300_s20, 128  }
  0x5a   : > { %1513 = vsyncadd (%p2036_p3), %s300_s20, 4294967168  ;;  %p2037_p4 = scmp.eq.s32.totalorder %s1639_s30, 0 }
  0x5c   : > { %1515 = dma.done.wait (%p2037_p4), [#allocation6], 256   ;;  %p2038_p13 = pmov %p2037_p4 }
  0x5d   : > { %vm352_vm0 = vcmask 261120   ;;  %v349_v0 = vld [vmem:[%s303_s16] sm:$0xff]  ;;  %v1340_v7 = vld [vmem:[#allocation5] sm:$0xff]   ;;  %v1554_v8 = vmov 0.0   ;;  %vm1555_vm1 = vmmov 0   ;;  %v1341_v9 = vld [vmem:[#allocation5 + $0x8] sm:$0xff]   ;;  %v459_v29 = vlaneseq }
  0x5e   : > { %1517 = vsyncadd (%p2038_p13), [#allocation6], 4294967040  ;;  %v353_v1 = vsel %vm352_vm0, %v349_v0, 0.0  ;;  %1236 = vmatprep.subr.bf16.mxu0 %v1554_v8  ;;  %1240 = vmatprep.mubr.msk.bf16.mxu0 %vm1555_vm1, %v1554_v8  ;;  %v1213_v14 = vld [vmem:[%s2012_s1] ss:$0 sm:$0xff]  ;;  %s1556_s13 = smov 104  }
  0x5f   : > { %354 = vadd.xlane.f32.xlu0 %v353_v1  ;;  %1237 = vmatpush3.bf16.msra.mxu0 %v1340_v7  ;;  %v1214_v16 = vld [vmem:[%s2013_s2] ss:$0 sm:$0xff]  ;;  %s1557_s17 = smov 120   ;;  %s1558_s22 = smov 112   ;;  %v1561_v27 = vmov 1983009808  }
  0x60   : > { %1238 = vmatprep.subr.bf16.mxu0 %v1554_v8  ;;  %v1215_v20 = vld [vmem:[%s2015_s4] ss:$0 sm:$0xff]  ;;  %s1559_s8 = smov 96   ;;  %s1560_s12 = smov 64   ;;  %v457_v28 = vunpack.c.l.s4 %v1561_v27  ;;  %v1562_v30 = vmov 1934713408  }
  0x61   : > { %v474_v31 = vunpack.c.l.s4 %v1562_v30  ;;  %v460_v33 = vshrl.u32 %v459_v29, 7  ;;  %v1563_v50 = vmov 0   ;;  %s1809_s20 = sshll.u32 %s1755_s15, 4  ;;  %vm621_vm2 = vcmask 60416   ;;  %s1819_s3 = sshll.u32 %s1540_s27, 8 }
  0x62   : > { %v458_v32 = vunpack.c.0.s8 %v457_v28  ;;  %s333_s16 = scalar_lea.vmem [#allocation7], %s1809_s20  ;;  %s1826_s18 = scalar_lea.hbm %s2016_s5, %s1819_s3 }
  0x63   : > { %1239 = vmatpush3.bf16.msra.mxu0 %v1341_v9  ;;  %v475_v34 = vunpack.c.0.s8 %v474_v31  ;;  %s1007_s14 = sshll.u32 %s333_s16, 4  ;;  %s983_s19 = scalar_lea.sflag [#allocation4], %s1755_s15  ;;  %s1828_s14 = int_to_ptr.vmem [resolvable:$true] %s1007_s14 }
  0x64   : > { %v1781_v35 = vsub.s32 %v458_v32, %v460_v33  ;;  %s1564_s27 = smov [#allocation7]  }
  0x65   : > { %v1784_v39 = vsub.s32 %v475_v34, %v460_v33 }
  0xec   : > { %v355_v2 = vpop.xlane.xlu0 %354 }
  0xed   : > { %v357_v3 = vmul.f32 0.03125, %v355_v2 }
  0xef   : > { %v358_v4 = vsub.f32 %v349_v0, %v357_v3 }
  0xf1   : > { %v359_v5 = vmul.f32 %v358_v4, %v358_v4 }
  0xf3   : > { %v360_v6 = vsel %vm352_vm0, %v359_v5, 0.0 }
  0xf4   : > { %361 = vadd.xlane.f32.xlu0 %v360_v6 }
 0x181   : > { %v362_v10 = vpop.xlane.xlu0 %361 }
 0x182   : > { %v363_v11 = vmul.f32 0.03125, %v362_v10 }
 0x184   : > { %v364_v12 = vadd.f32 1e-05, %v363_v11 }
 0x186   : > { %1342 = vrsqrt.f32 %v364_v12 }
 0x190   : > { %v1343_v13 = vpop.eup %1342 }
 0x191   : > { %v366_v15 = vmul.f32 %v1343_v13, %v358_v4 }
 0x193   : > { %v373_v17 = vmul.f32 %v1213_v14, %v366_v15 }
 0x195   : > { %v380_v18 = vadd.f32 %v1214_v16, %v373_v17 }
 0x197   : > { %v381_v19 = vpack.c.bf16 %v380_v18, %v380_v18 }
 0x199   : > { %1241 = vmatmul.mubr.msk.bf16.vlgmr.msra.gmra.mrb[0].mxu0 %vm352_vm0, %v381_v19 }
 0x26c   : > { %v442_v21 = vpop.f32.mrb[0].mxu0 }
 0x26d   : > { %v443_v22 = vadd.f32 %v1215_v20, %v442_v21  ;;  %v1242_v23 = vpop.f32.mrb[1].mxu0 }
 0x26e   : > { %v445_v24 = vpop.f32.mrb[2].mxu0 }
 0x26f   : > { %v448_v25 = vpack.c.bf16 %v443_v22, %v443_v22  ;;  %v1243_v26 = vpop.f32.mrb[3].mxu0 }
 0x271   : > { %454 = vrot.lane.b32.xlu0 %v448_v25, %s1556_s13  ;;  %450 = vrot.lane.b32.xlu1 %v448_v25, %s1557_s17  ;;  %v462_v46 = vrot.slane %v448_v25, %v1781_v35  ;;  %s1402_s13 = scalar_lea.vmem %s1828_s14, 256  ;;  %s1406_s17 = sshll.u32 %s1564_s27, 4  ;;  %s1407_s17 = int_to_ptr.vmem [resolvable:$false] %s1406_s17 }
 0x272   : > { %p1403_p6 = scmp.ne.s32.totalorder %s1828_s14, %s1402_s13  ;;  %p1409_p11 = scmp.lt.s32.totalorder %s1828_s14, %s1407_s17 }
 0x274   : > { %p1404_p8 = pnand %p1403_p6, %p1702_p10 }
 0x275   : > { %452 = vrot.lane.b32.xlu1 %v448_v25, %s1558_s22  ;;  %s1408_s22 = scalar_lea.vmem %s1407_s17, 512 }
 0x276   : > { %p1405_p12 = pneg %p1404_p8  ;;  %p1410_p0 = scmp.lt.s32.totalorder %s1408_s22, %s1402_s13 }
 0x278   : > { %p1411_p5 = por %p1410_p0, %p1409_p11 }
 0x279   : > { %626 = vrot.lane.b32.xlu1 %v448_v25, %s1559_s8 }
 0x27a   : > { %p1412_p9 = pnand %p1411_p5, %p1405_p12 }
 0x27d   : > { %804 = vrot.lane.b32.xlu1 %v448_v25, %s1560_s12 }
 0x2e3   : > { %v455_v36 = vpop.permute.xlu0 %454  ;;  %v451_v37 = vpop.permute.xlu1 %450 }
 0x2e4   : > { %v504_v38 = vrot.slane %v455_v36, %v1781_v35  ;;  %v496_v40 = vrot.slane %v451_v37, %v1781_v35  ;;  %628 = vrot.lane.b32.xlu1 %v451_v37, %s1559_s8 }
 0x2e6   : > { %v505_v41 = vcombine.low %v496_v40, %v504_v38  ;;  %v506_v42 = vcombine.high %v496_v40, %v504_v38 }
 0x2e7   : > { %v453_v43 = vpop.permute.xlu1 %452 }
 0x2e8   : > { %v513_v44 = vrot.slane %v505_v41, %v1784_v39  ;;  %v470_v45 = vrot.slane %v453_v43, %v1781_v35  ;;  %808 = vrot.lane.b32.xlu0 %v453_v43, %s1560_s12  ;;  %630 = vrot.lane.b32.xlu1 %v453_v43, %s1559_s8  ;;  %v520_v47 = vrot.slane %v506_v42, %v1784_v39 }
 0x2ea   : > { %v471_v48 = vcombine.low %v462_v46, %v470_v45  ;;  %v472_v49 = vcombine.high %v462_v46, %v470_v45  ;;  %v521_v51 = vcombine.high %v513_v44, %v1563_v50  ;;  %v522_v54 = vcombine.high %v520_v47, %v1563_v50 }
 0x2eb   : > { %v528_v55 = vshrl.u32 %v513_v44, 16  ;;  %v544_v61 = vshrl.u32 %v520_v47, 16 }
 0x2ec   : > { %632 = vrot.lane.b32.xlu1 %v455_v36, %s1559_s8  ;;  %v479_v52 = vrot.slane %v471_v48, %v1784_v39  ;;  %v486_v53 = vrot.slane %v472_v49, %v1784_v39  ;;  %v536_v60 = vshrl.u32 %v521_v51, 16  ;;  %v552_v4 = vshrl.u32 %v522_v54, 16 }
 0x2ee   : > { %v487_v56 = vcombine.high %v479_v52, %v1563_v50  ;;  %v488_v57 = vcombine.high %v486_v53, %v1563_v50  ;;  %v525_v58 = vpack.i.b16 %v513_v44, %v479_v52  ;;  %v527_v59 = vshrl.u32 %v479_v52, 16 }
 0x2ef   : > { %v541_v62 = vpack.i.b16 %v520_v47, %v486_v53  ;;  %v543_v63 = vshrl.u32 %v486_v53, 16 }
 0x2f0   : > { %806 = vrot.lane.b32.xlu1 %v451_v37, %s1560_s12  ;;  %v529_v0 = vpack.i.b16 %v528_v55, %v527_v59  ;;  %v533_v1 = vpack.i.b16 %v521_v51, %v487_v56  ;;  %v535_v2 = vshrl.u32 %v487_v56, 16  ;;  %v549_v3 = vpack.i.b16 %v522_v54, %v488_v57 }
 0x2f1   : > { %v545_v5 = vpack.i.b16 %v544_v61, %v543_v63  ;;  %v551_v6 = vshrl.u32 %v488_v57, 16  ;;  %v555_v7 = vcombine.low %v525_v58, %v541_v62 }
 0x2f2   : > { %v537_v8 = vpack.i.b16 %v536_v60, %v535_v2  ;;  %v563_v9 = vcombine.low %v533_v1, %v549_v3 }
 0x2f3   : > { %v553_v10 = vpack.i.b16 %v552_v4, %v551_v6  ;;  %v580_v11 = vcombine.low %v529_v0, %v545_v5  ;;  %v562_v12 = vrot.slane %v555_v7, %v1781_v35 }
 0x2f4   : > { %810 = vrot.lane.b32.xlu1 %v455_v36, %s1560_s12  ;;  %v570_v13 = vrot.slane %v563_v9, %v1781_v35 }
 0x2f5   : > { %v588_v14 = vcombine.low %v537_v8, %v553_v10  ;;  %v587_v16 = vrot.slane %v580_v11, %v1781_v35 }
 0x2f6   : > { %v571_v15 = vcombine.low %v562_v12, %v570_v13 }
 0x2f7   : > { %v595_v17 = vrot.slane %v588_v14, %v1781_v35 }
 0x2f8   : > { %v578_v18 = vrot.slane %v571_v15, %v1784_v39 }
 0x2f9   : > { %v596_v19 = vcombine.low %v587_v16, %v595_v17 }
 0x2fa   : > { %v579_v20 = vcombine.high %v578_v18, %v1563_v50  ;;  %v609_v24 = vshrl.u32 %v578_v18, 16 }
 0x2fb   : > { %v603_v21 = vrot.slane %v596_v19, %v1784_v39 }
 0x2fc   : > { %v617_v28 = vshrl.u32 %v579_v20, 16 }
 0x2fd   : > { %v604_v22 = vcombine.high %v603_v21, %v1563_v50  ;;  %v607_v23 = vpack.i.b16 %v603_v21, %v578_v18  ;;  %v610_v25 = vshrl.u32 %v603_v21, 16 }
 0x2ff   : > { %v611_v26 = vpack.i.b16 %v610_v25, %v609_v24  ;;  %v615_v27 = vpack.i.b16 %v604_v22, %v579_v20  ;;  %v618_v29 = vshrl.u32 %v604_v22, 16  ;;  %622 = vst.msk [vmem:[%s333_s16] sm:$0xf] %vm621_vm2, %v607_v23 }
 0x301   : > { %v619_v30 = vpack.i.b16 %v618_v29, %v617_v28  ;;  %623 = vst.msk [vmem:[%s333_s16 + $0x4] sm:$0xf] %vm621_vm2, %v611_v26  ;;  %624 = vst.msk [vmem:[%s333_s16 + $0x8] sm:$0xf] %vm621_vm2, %v615_v27 }
 0x303   : > { %625 = vst.msk [vmem:[%s333_s16 + $0xc] sm:$0xf] %vm621_vm2, %v619_v30 }
 0x304   : > { %1415 = shalt.err (!%p1412_p9)
}
 0x305   : > { %s1416_s8 = scalar_lea.hbm %s1826_s18, 256  ;;  %s1420_s11 = scalar_lea.hbm %s2016_s5, 512 }
 0x306   : > { %p1417_p1 = scmp.ne.s32.totalorder %s1826_s18, %s1416_s8  ;;  %p1421_p3 = scmp.lt.u32.totalorder %s1826_s18, %s2016_s5 }
 0x307   : > { %p1422_p4 = scmp.lt.u32.totalorder %s1420_s11, %s1416_s8  ;;  %p1424_p6 = scmp.lt.u32.totalorder %s1416_s8, %s1826_s18 }
 0x308   : > { %p1418_p2 = pnand %p1417_p1, %p1702_p10 }
 0x309   : > { %p1423_p13 = por %p1422_p4, %p1421_p3 }
 0x30a   : > { %p1419_p7 = pneg %p1418_p2 }
 0x30b   : > { %p1425_p8 = por %p1424_p6, %p1423_p13 }
 0x30d   : > { %p1426_p12 = pnand %p1425_p8, %p1419_p7 }
 0x30f   : > { %1429 = shalt.err (!%p1426_p12)
}
 0x310   : > { %s1565_s13 = smov 4   ;;  %v627_v31 = vpop.permute.xlu1 %626  ;;  %s987_s15 = sand.u32 1, %s1639_s30  }
 0x311   : > { %1250 = dma.vmem_to_hbm [thread:$0]  (%p1702_p10), %s1828_s14, 256, %s1826_s18, %s983_s19, %s1560_s12, %s1560_s12, %s1565_s13   ;;  %v641_v37 = vrot.slane %v627_v31, %v1781_v35 }
 0x312   : > { %s340_s18 = scalar_lea.vmem [#allocation8], %s1809_s20  ;;  %s1913_s22 = scalar_lea.hbm %s2017_s6, %s1819_s3 }
 0x313   : > { %s1024_s14 = sshll.u32 %s340_s18, 4  ;;  %s1921_s8 = scalar_lea.sflag [#allocation9], %s987_s15  ;;  %s1915_s14 = int_to_ptr.vmem [resolvable:$true] %s1024_s14 }
 0x314   : > { %v805_v32 = vpop.permute.xlu1 %804  ;;  %s1430_s16 = scalar_lea.vmem %s1915_s14, 256  ;;  %s1566_s9 = smov [#allocation8]  }
 0x315   : > { %v819_v38 = vrot.slane %v805_v32, %v1781_v35  ;;  %p1431_p11 = scmp.ne.s32.totalorder %s1915_s14, %s1430_s16  ;;  %s1434_s11 = sshll.u32 %s1566_s9, 4  ;;  %s1435_s11 = int_to_ptr.vmem [resolvable:$false] %s1434_s11 }
 0x316   : > { %s1436_s27 = scalar_lea.vmem %s1435_s11, 512  ;;  %p1437_p9 = scmp.lt.s32.totalorder %s1915_s14, %s1435_s11 }
 0x317   : > { %p1432_p0 = pnand %p1431_p11, %p1702_p10  ;;  %p1438_p1 = scmp.lt.s32.totalorder %s1436_s27, %s1430_s16 }
 0x319   : > { %p1433_p5 = pneg %p1432_p0  ;;  %p1439_p2 = por %p1438_p1, %p1437_p9 }
 0x31b   : > { %p1440_p7 = pnand %p1439_p2, %p1433_p5 }
 0x356   : > { %v629_v33 = vpop.permute.xlu1 %628 }
 0x357   : > { %v675_v52 = vrot.slane %v629_v33, %v1781_v35 }
 0x35a   : > { %v809_v34 = vpop.permute.xlu0 %808  ;;  %v631_v36 = vpop.permute.xlu1 %630 }
 0x35b   : > { %v827_v40 = vrot.slane %v809_v34, %v1781_v35  ;;  %v649_v41 = vrot.slane %v631_v36, %v1781_v35 }
 0x35d   : > { %v828_v42 = vcombine.low %v819_v38, %v827_v40  ;;  %v829_v43 = vcombine.high %v819_v38, %v827_v40  ;;  %v650_v44 = vcombine.low %v641_v37, %v649_v41  ;;  %v651_v45 = vcombine.high %v641_v37, %v649_v41 }
 0x35e   : > { %v633_v46 = vpop.permute.xlu1 %632 }
 0x35f   : > { %v658_v47 = vrot.slane %v650_v44, %v1784_v39  ;;  %v665_v48 = vrot.slane %v651_v45, %v1784_v39  ;;  %v1864_v49 = vrot.slane %v828_v42, %v1784_v39  ;;  %v683_v51 = vrot.slane %v633_v46, %v1781_v35 }
 0x360   : > { %v1869_v53 = vrot.slane %v829_v43, %v1784_v39 }
 0x361   : > { %v666_v54 = vcombine.high %v658_v47, %v1563_v50  ;;  %v667_v55 = vcombine.high %v665_v48, %v1563_v50  ;;  %v684_v57 = vcombine.low %v675_v52, %v683_v51  ;;  %v685_v58 = vcombine.high %v675_v52, %v683_v51 }
 0x362   : > { %v807_v56 = vpop.permute.xlu1 %806  ;;  %v844_v59 = vcombine.high %v1864_v49, %v1563_v50  ;;  %v845_v60 = vcombine.high %v1869_v53, %v1563_v50  ;;  %v884_v61 = vshrl.u32 %v1864_v49, 16  ;;  %v706_v0 = vshrl.u32 %v658_v47, 16 }
 0x363   : > { %v692_v62 = vrot.slane %v684_v57, %v1784_v39  ;;  %v699_v63 = vrot.slane %v685_v58, %v1784_v39  ;;  %v714_v1 = vshrl.u32 %v666_v54, 16  ;;  %v722_v2 = vshrl.u32 %v665_v48, 16 }
 0x364   : > { %v730_v3 = vshrl.u32 %v667_v55, 16  ;;  %v853_v11 = vrot.slane %v807_v56, %v1781_v35  ;;  %v900_v21 = vshrl.u32 %v1869_v53, 16  ;;  %v892_v25 = vshrl.u32 %v844_v59, 16 }
 0x365   : > { %v700_v5 = vcombine.high %v692_v62, %v1563_v50  ;;  %v701_v6 = vcombine.high %v699_v63, %v1563_v50  ;;  %v704_v7 = vpack.i.b16 %v692_v62, %v658_v47  ;;  %v707_v8 = vshrl.u32 %v692_v62, 16 }
 0x366   : > { %v811_v4 = vpop.permute.xlu1 %810  ;;  %v720_v9 = vpack.i.b16 %v699_v63, %v665_v48  ;;  %v723_v10 = vshrl.u32 %v699_v63, 16  ;;  %v908_v29 = vshrl.u32 %v845_v60, 16 }
 0x367   : > { %v861_v12 = vrot.slane %v811_v4, %v1781_v35  ;;  %v708_v13 = vpack.i.b16 %v707_v8, %v706_v0  ;;  %v712_v14 = vpack.i.b16 %v700_v5, %v666_v54  ;;  %v715_v15 = vshrl.u32 %v700_v5, 16 }
 0x368   : > { %v728_v16 = vpack.i.b16 %v701_v6, %v667_v55  ;;  %v724_v17 = vpack.i.b16 %v723_v10, %v722_v2  ;;  %v731_v18 = vshrl.u32 %v701_v6, 16  ;;  %v734_v19 = vcombine.low %v704_v7, %v720_v9 }
 0x369   : > { %v862_v20 = vcombine.low %v853_v11, %v861_v12  ;;  %v716_v22 = vpack.i.b16 %v715_v15, %v714_v1  ;;  %v863_v24 = vcombine.high %v853_v11, %v861_v12 }
 0x36a   : > { %v742_v23 = vcombine.low %v712_v14, %v728_v16  ;;  %v732_v26 = vpack.i.b16 %v731_v18, %v730_v3  ;;  %v759_v27 = vcombine.low %v708_v13, %v724_v17  ;;  %v741_v30 = vrot.slane %v734_v19, %v1781_v35 }
 0x36b   : > { %v870_v28 = vrot.slane %v862_v20, %v1784_v39  ;;  %v877_v32 = vrot.slane %v863_v24, %v1784_v39 }
 0x36c   : > { %v749_v31 = vrot.slane %v742_v23, %v1781_v35  ;;  %v766_v33 = vrot.slane %v759_v27, %v1781_v35  ;;  %v767_v34 = vcombine.low %v716_v22, %v732_v26 }
 0x36d   : > { %v878_v36 = vcombine.high %v870_v28, %v1563_v50  ;;  %v882_v37 = vpack.i.b16 %v870_v28, %v1864_v49  ;;  %v879_v40 = vcombine.high %v877_v32, %v1563_v50  ;;  %v885_v41 = vshrl.u32 %v870_v28, 16 }
 0x36e   : > { %v750_v38 = vcombine.low %v741_v30, %v749_v31  ;;  %v898_v42 = vpack.i.b16 %v877_v32, %v1869_v53  ;;  %v774_v43 = vrot.slane %v767_v34, %v1781_v35  ;;  %v901_v46 = vshrl.u32 %v877_v32, 16 }
 0x36f   : > { %v890_v44 = vpack.i.b16 %v878_v36, %v844_v59  ;;  %v893_v45 = vshrl.u32 %v878_v36, 16  ;;  %v886_v48 = vpack.i.b16 %v885_v41, %v884_v61  ;;  %v906_v51 = vpack.i.b16 %v879_v40, %v845_v60 }
 0x370   : > { %v757_v47 = vrot.slane %v750_v38, %v1784_v39  ;;  %v909_v52 = vshrl.u32 %v879_v40, 16  ;;  %v775_v54 = vcombine.low %v766_v33, %v774_v43  ;;  %v902_v49 = vpack.i.b16 %v901_v46, %v900_v21 }
 0x371   : > { %v894_v55 = vpack.i.b16 %v893_v45, %v892_v25  ;;  %v912_v56 = vcombine.low %v882_v37, %v898_v42  ;;  %v920_v58 = vcombine.low %v890_v44, %v906_v51 }
 0x372   : > { %v910_v57 = vpack.i.b16 %v909_v52, %v908_v29  ;;  %v758_v53 = vcombine.high %v757_v47, %v1563_v50  ;;  %v782_v62 = vrot.slane %v775_v54, %v1784_v39  ;;  %v937_v59 = vcombine.low %v886_v48, %v902_v49 }
 0x373   : > { %v919_v63 = vrot.slane %v912_v56, %v1781_v35  ;;  %v927_v0 = vrot.slane %v920_v58, %v1781_v35  ;;  %v788_v2 = vshrl.u32 %v757_v47, 16 }
 0x374   : > { %v945_v61 = vcombine.low %v894_v55, %v910_v57  ;;  %v783_v60 = vcombine.high %v782_v62, %v1563_v50  ;;  %v786_v1 = vpack.i.b16 %v782_v62, %v757_v47  ;;  %v789_v3 = vshrl.u32 %v782_v62, 16 }
 0x375   : > { %v928_v4 = vcombine.low %v919_v63, %v927_v0  ;;  %v944_v5 = vrot.slane %v937_v59, %v1781_v35  ;;  %v796_v9 = vshrl.u32 %v758_v53, 16 }
 0x376   : > { %v952_v6 = vrot.slane %v945_v61, %v1781_v35  ;;  %v790_v7 = vpack.i.b16 %v789_v3, %v788_v2  ;;  %v794_v8 = vpack.i.b16 %v783_v60, %v758_v53  ;;  %v797_v10 = vshrl.u32 %v783_v60, 16  ;;  %800 = vst.msk [vmem:[%s340_s18] sm:$0xf] %vm621_vm2, %v786_v1 }
 0x377   : > { %v935_v11 = vrot.slane %v928_v4, %v1784_v39 }
 0x378   : > { %v953_v12 = vcombine.low %v944_v5, %v952_v6  ;;  %v798_v13 = vpack.i.b16 %v797_v10, %v796_v9  ;;  %801 = vst.msk [vmem:[%s340_s18 + $0x4] sm:$0xf] %vm621_vm2, %v790_v7  ;;  %802 = vst.msk [vmem:[%s340_s18 + $0x8] sm:$0xf] %vm621_vm2, %v794_v8 }
 0x379   : > { %v936_v35 = vcombine.high %v935_v11, %v1563_v50  ;;  %v966_v17 = vshrl.u32 %v935_v11, 16 }
 0x37a   : > { %v960_v14 = vrot.slane %v953_v12, %v1784_v39  ;;  %803 = vst.msk [vmem:[%s340_s18 + $0xc] sm:$0xf] %vm621_vm2, %v798_v13 }
 0x37c   : > { %v961_v15 = vcombine.high %v960_v14, %v1563_v50  ;;  %v964_v16 = vpack.i.b16 %v960_v14, %v935_v11  ;;  %v967_v18 = vshrl.u32 %v960_v14, 16 }
 0x37d   : > { %1443 = shalt.err (!%p1440_p7)
}
 0x37e   : > { %s1444_s17 = scalar_lea.hbm %s1913_s22, 256  ;;  %s1448_s30 = scalar_lea.hbm %s2017_s6, 512 }
 0x37f   : > { %p1445_p3 = scmp.ne.s32.totalorder %s1913_s22, %s1444_s17  ;;  %p1449_p6 = scmp.lt.u32.totalorder %s1913_s22, %s2017_s6 }
 0x380   : > { %p1450_p8 = scmp.lt.u32.totalorder %s1448_s30, %s1444_s17  ;;  %p1452_p11 = scmp.lt.u32.totalorder %s1444_s17, %s1913_s22 }
 0x381   : > { %p1446_p4 = pnand %p1445_p3, %p1702_p10 }
 0x382   : > { %p1451_p12 = por %p1450_p8, %p1449_p6 }
 0x383   : > { %p1447_p13 = pneg %p1446_p4 }
 0x384   : > { %p1453_p0 = por %p1452_p11, %p1451_p12 }
 0x386   : > { %p1454_p5 = pnand %p1453_p0, %p1447_p13 }
 0x388   : > { %1457 = shalt.err (!%p1454_p5)
}
 0x389   : > { %1251 = dma.vmem_to_hbm [thread:$0]  (%p1702_p10), %s1915_s14, 256, %s1913_s22, %s1921_s8, %s1560_s12, %s1560_s12, %s1565_s13   ;;  %v968_v39 = vpack.i.b16 %v967_v18, %v966_v17  ;;  %v972_v50 = vpack.i.b16 %v961_v15, %v936_v35  ;;  %v974_v19 = vshrl.u32 %v936_v35, 16  ;;  %v975_v20 = vshrl.u32 %v961_v15, 16 }
 0x38a   : > { %s347_s16 = scalar_lea.vmem [#allocation10], %s1809_s20  ;;  %s1956_s15 = scalar_lea.hbm %s2018_s7, %s1819_s3 }
 0x38b   : > { %s1041_s11 = sshll.u32 %s347_s16, 4  ;;  %978 = vst.msk [vmem:[%s347_s16] sm:$0xf] %vm621_vm2, %v964_v16  ;;  %v976_v21 = vpack.i.b16 %v975_v20, %v974_v19  ;;  %979 = vst.msk [vmem:[%s347_s16 + $0x4] sm:$0xf] %vm621_vm2, %v968_v39  ;;  %s1567_s14 = smov [#allocation10]   ;;  %s1958_s11 = int_to_ptr.vmem [resolvable:$true] %s1041_s11 }
 0x38c   : > { %980 = vst.msk [vmem:[%s347_s16 + $0x8] sm:$0xf] %vm621_vm2, %v972_v50  ;;  %s1458_s20 = scalar_lea.vmem %s1958_s11, 256  ;;  %s1462_s22 = sshll.u32 %s1567_s14, 4  ;;  %s1463_s22 = int_to_ptr.vmem [resolvable:$false] %s1462_s22 }
 0x38d   : > { %981 = vst.msk [vmem:[%s347_s16 + $0xc] sm:$0xf] %vm621_vm2, %v976_v21  ;;  %p1459_p9 = scmp.ne.s32.totalorder %s1958_s11, %s1458_s20  ;;  %s1464_s18 = scalar_lea.vmem %s1463_s22, 512 }
 0x38e   : > { %p1465_p7 = scmp.lt.s32.totalorder %s1958_s11, %s1463_s22  ;;  %p1466_p3 = scmp.lt.s32.totalorder %s1464_s18, %s1458_s20 }
 0x38f   : > { %p1460_p1 = pnand %p1459_p9, %p1702_p10 }
 0x390   : > { %p1467_p4 = por %p1466_p3, %p1465_p7 }
 0x391   : > { %p1461_p2 = pneg %p1460_p1 }
 0x393   : > { %p1468_p13 = pnand %p1467_p4, %p1461_p2 }
 0x395   : > { %1471 = shalt.err (!%p1468_p13)
}
 0x396   : > { %s1472_s3 = scalar_lea.hbm %s1956_s15, 256  ;;  %s1476_s9 = scalar_lea.hbm %s2018_s7, 512 }
 0x397   : > { %p1473_p6 = scmp.ne.s32.totalorder %s1956_s15, %s1472_s3  ;;  %p1477_p11 = scmp.lt.u32.totalorder %s1956_s15, %s2018_s7 }
 0x398   : > { %p1478_p0 = scmp.lt.u32.totalorder %s1476_s9, %s1472_s3  ;;  %p1480_p9 = scmp.lt.u32.totalorder %s1472_s3, %s1956_s15 }
 0x399   : > { %p1474_p8 = pnand %p1473_p6, %p1702_p10 }
 0x39a   : > { %p1479_p5 = por %p1478_p0, %p1477_p11 }
 0x39b   : > { %p1475_p12 = pneg %p1474_p8 }
 0x39c   : > { %p1481_p1 = por %p1480_p9, %p1479_p5 }
 0x39e   : > { %p1482_p2 = pnand %p1481_p1, %p1475_p12 }
 0x3a0   : > { %1485 = shalt.err (!%p1482_p2)
}
 0x3a1   : > { %1252 = dma.vmem_to_hbm [thread:$0]  (%p1702_p10), %s1958_s11, 256, %s1956_s15, %s1921_s8, %s1560_s12, %s1560_s12, %s1565_s13  }
 0x3a2 PF: > { %s1056_s17 = sand.u32 1, %s1528_s24   ;;  %p2039_p7 = scmp.ne.s32.totalorder %s2026_s10, 0 }
 0x3a3   : > { %p2040_p3 = scmp.ge.s32.totalorder %s1548_s29, 2  ;;  %s1057_s20 = scalar_lea.sflag [#allocation4], %s1056_s17 }
 0x3a5   : > { %p1265_p4 = pnand %p2040_p3, %p2039_p7 }
 0x3a7   : > { %1519 = dma.done.wait (!%p1265_p4), %s1057_s20, 256  }
 0x3a8   : > { %1521 = vsyncadd (!%p1265_p4), %s1057_s20, 4294967040  ;;  %s2041_s21 = sadd.s32 4294967294, %s1548_s29  }
 0x3a9   : > { %s1065_s14 = sand.u32 1, %s2041_s21  }
 0x3aa   : > { %s1066_s22 = scalar_lea.sflag [#allocation9], %s1065_s14 }
 0x3ab   : > { %1523 = dma.done.wait (!%p1265_p4), %s1066_s22, 512  }
 0x3ac   : > { %1525 = vsyncadd (!%p1265_p4), %s1066_s22, 4294966784  ;;  %s28_s29 = sadd.s32 1, %s1548_s29   ;;  %s2042_s12 = sld [smem:[#allocation15_spill]] }
 0x3ad   : > { %p25_p10 = scmp.ge.s32.totalorder %s28_s29, 4   ;;  %s2043_s24 = smov %s1532_s25 }
 0x3ae   : > { %s2044_s25 = smov %s1536_s26  ;;  %s2045_s26 = smov %s1711_s23 }
 0x3af   : > { %s2046_s27 = smov %s1544_s28  ;;  %27 = sbr.rel (!%p25_p10) target bundleno = 11 (0xb), region = 121 }
 0x3b2   : > { %s2047_s28 = smov %s2042_s12 }
 0x3b6   :  { %1080 = vsyncpa [#allocation3], 1 }
 0x3b7   :  { %1082 = vsyncpa [#allocation3 + $0x1], 1 }
 0x3b8   :  { %1083 = vsyncpa [#allocation6], 1 }
 0x3b9   :  { %1084 = vsyncpa [#allocation4], 1 }
 0x3ba   :  { %1086 = vsyncpa [#allocation4 + $0x1], 1 }
 0x3bb   :  { %1087 = vsyncpa [#allocation9], 1 }
 0x3bc   :  { %1089 = vsyncpa [#allocation9 + $0x1], 1 }

</bundles_post_ra>
